<compile_context>
chip_gen: v5e
topology: v5e:2x2
jax: 0.10.0
libtpu: 0.0.40
codegen_flags: <defaults>
</compile_context>

<pallas_src>
import numpy as np
import jax
import jax.numpy as jnp
from jax.experimental import pallas as pl
from jax.experimental.pallas import tpu as pltpu


def _round_up(x, m):
    return ((x + m - 1) // m) * m


# ---------------------------------------------------------------------------------------------
# Fused kernel: se3_exp + (K @ M) vertex projection + squared-error loss
# ---------------------------------------------------------------------------------------------
def _fused_forward_kernel(T_ref, K_ref, verts_ref, imref_ref, M_ref, proj_ref, loss_ref):
    # ---- se3_exp on (1,1)-element values ------------------------------------------------------
    T = T_ref[...]                                   # (1, 6) = [t_x t_y t_z phi_x phi_y phi_z]
    t = [T[:, i:i + 1] for i in range(3)]            # (1,1) each
    p = [T[:, 3 + i:4 + i] for i in range(3)]        # (1,1) each

    # keep the exact reference formulation: angle = |phi| + 1e-5  (NOT sqrt(|phi|^2 + eps))
    angle = jnp.sqrt(p[0] * p[0] + p[1] * p[1] + p[2] * p[2]) + 1e-5   # (1,1)
    inv_angle = 1.0 / angle                          # ONE exact reciprocal (was 5 divides)
    s = jnp.sin(angle)
    c = jnp.cos(angle)
    s_div = s * inv_angle
    oms_div = 1.0 - s_div
    omc = 1.0 - c
    omc_div = omc * inv_angle
    a = [p[i] * inv_angle for i in range(3)]         # unit axis components, (1,1) each

    def _rot(diag, off, wed):
        # rows of diag*I + off*outer(a,a) + wed*wedge(a), as a 3x3 list of (1,1) values
        return [
            [diag + off * a[0] * a[0], off * a[0] * a[1] - wed * a[2], off * a[0] * a[2] + wed * a[1]],
            [off * a[1] * a[0] + wed * a[2], diag + off * a[1] * a[1], off * a[1] * a[2] - wed * a[0]],
            [off * a[2] * a[0] - wed * a[1], off * a[2] * a[1] + wed * a[0], diag + off * a[2] * a[2]],
        ]

    R = _rot(c, omc, s)                 # rotation
    Rj = _rot(s_div, oms_div, omc_div)  # left SO(3) Jacobian
    trans = [Rj[i][0] * t[0] + Rj[i][1] * t[1] + Rj[i][2] * t[2] for i in range(3)]
    Mcoef = [[R[i][0], R[i][1], R[i][2], trans[i]] for i in range(3)]   # M = [R | trans]

    # ---- write M: 12 entries packed into lanes 0..11 of a full (8,128) tile, ONE unmasked store
    lane = jax.lax.broadcasted_iota(jnp.int32, (8, 128), 1)
    flat = [Mcoef[i][j] for i in range(3) for j in range(4)]
    m_tile = jnp.where(lane == 11, flat[11], 0.0)
    for idx in range(10, -1, -1):
        m_tile = jnp.where(lane == idx, flat[idx], m_tile)
    M_ref[...] = m_tile

    # ---- P = K @ M using scalar K coefficients from SMEM (P[i][j] are (1,1) values) -----------
    k = [[K_ref[i, l] for l in range(3)] for i in range(3)]
    P = [[k[i][0] * Mcoef[0][j] + k[i][1] * Mcoef[1][j] + k[i][2] * Mcoef[2][j]
          for j in range(4)] for i in range(3)]

    # ---- projection: one full-tile vertex load, VPU FMAs, approx reciprocal, one full-tile store
    v = verts_ref[...]                               # (8, Vp), rows 0/1/2 = x/y/z
    xs, ys, zs = v[0:1, :], v[1:2, :], v[2:3, :]
    pix0 = P[0][0] * xs + P[0][1] * ys + P[0][2] * zs + P[0][3]
    pix1 = P[1][0] * xs + P[1][1] * ys + P[1][2] * zs + P[1][3]
    pix2 = P[2][0] * xs + P[2][1] * ys + P[2][2] * zs + P[2][3]
    inv_z = pl.reciprocal(pix2, approx=True)         # EUP vrcp (own bundle slot)

    sub = jax.lax.broadcasted_iota(jnp.int32, (8, v.shape[1]), 0)
    proj_tile = jnp.where(sub == 0, pix0 * inv_z,
                jnp.where(sub == 1, pix1 * inv_z,
                jnp.where(sub == 2, 1.0, 0.0)))       # row 2 (z/z) written as exact ones
    proj_ref[...] = proj_tile

    # ---- loss = sum((image - image_ref)^2) -----------------------------------------------------
    # TODO(synk): rasterized silhouette stubbed to zeros, so (0 - imref)^2 == imref^2.
    im = imref_ref[...]
    dsq = im * im
    loss_ref[...] = jnp.sum(jnp.sum(dsq, axis=0, keepdims=True), axis=1, keepdims=True)


# ---------------------------------------------------------------------------------------------
# Model.forward() wrapper (one pallas_call)
# ---------------------------------------------------------------------------------------------
def model_forward(T, vertices, K, image_ref):
    V = vertices.shape[0]
    Vp = max(128, _round_up(V, 128))

    # lane/sublane-dense transposed vertices (8, Vp): rows 0/1/2 = x/y/z, padded z-lanes = 1.0
    # so the projective divide stays finite in unused columns; rows 3..7 are zero padding.
    verts_t = jnp.zeros((8, Vp), jnp.float32).at[2, :].set(1.0)
    verts_t = verts_t.at[:3, :V].set(vertices.T.astype(jnp.float32))

    H, W = image_ref.shape
    imref2d = image_ref.astype(jnp.float32)
    if W % 128 != 0 and (H * W) % 128 == 0:
        # only fold to a lane-dense view when W itself is not already lane-dense
        imref2d = imref2d.reshape((H * W) // 128, 128)

    M_tile, proj_full, loss11 = pl.pallas_call(
        _fused_forward_kernel,
        in_specs=[
            pl.BlockSpec(memory_space=pltpu.MemorySpace.VMEM),   # T  (1, 6)
            pl.BlockSpec(memory_space=pltpu.MemorySpace.SMEM),   # K  (3, 3) scalar coefficients
            pl.BlockSpec(memory_space=pltpu.MemorySpace.VMEM),   # vertices_t (8, Vp)
            pl.BlockSpec(memory_space=pltpu.MemorySpace.VMEM),   # image_ref (lane-dense view)
        ],
        out_specs=(
            pl.BlockSpec(memory_space=pltpu.MemorySpace.VMEM),   # M packed in one (8,128) tile
            pl.BlockSpec(memory_space=pltpu.MemorySpace.VMEM),   # proj (8, Vp)
            pl.BlockSpec(memory_space=pltpu.MemorySpace.VMEM),   # loss (1, 1)
        ),
        out_shape=(
            jax.ShapeDtypeStruct((8, 128), jnp.float32),
            jax.ShapeDtypeStruct((8, Vp), jnp.float32),
            jax.ShapeDtypeStruct((1, 1), jnp.float32),
        ),
    )(T.astype(jnp.float32), K.astype(jnp.float32), verts_t, imref2d)

    loss = loss11[0, 0]
    M = M_tile[0, :12].reshape(1, 3, 4)   # same semantics as the torch se3_exp output
    proj_t = proj_full[:3, :]             # rows x'/z', y'/z', 1; valid columns are [:, :V]
    return loss, M, proj_t


# ---------------------------------------------------------------------------------------------
# Pure numpy reference (for the parts we implemented) + driver
# ---------------------------------------------------------------------------------------------
def _se3_exp_reference(T):
    T = np.asarray(T, np.float64)
    t, phi = T[:, :3], T[:, 3:]
    angle = np.linalg.norm(phi, axis=1) + 1e-5
    s, c = np.sin(angle), np.cos(angle)
    axis = phi / angle[:, None]
    I = np.eye(3)
    out = []
    for b in range(T.shape[0]):
        a = axis[b]
        aa = np.outer(a, a)
        W = np.array([[0, -a[2], a[1]], [a[2], 0, -a[0]], [-a[1], a[0], 0]])
        R = c[b] * I + (1 - c[b]) * aa + s[b] * W
        Rj = ((s[b] / angle[b]) * I + (1 - s[b] / angle[b]) * aa
              + ((1 - c[b]) / angle[b]) * W)
        trans = Rj @ t[b]
        out.append(np.concatenate([R, trans[:, None]], axis=1))
    return np.stack(out).astype(np.float32)


if __name__ == "__main__":
    key = jax.random.PRNGKey(0)
    kv, kr = jax.random.split(key)

    V, H, W = 64, 64, 64
    # deterministic parameter, exactly as in Model.__init__
    T = jnp.asarray([[1.0, 2.0, 3.0, 1.0, 0.0, 0.0]], dtype=jnp.float32)
    vertices = jax.random.normal(kv, (V, 3), dtype=jnp.float32) * 0.5
    image_ref = jax.random.bernoulli(kr, 0.3, (H, W)).astype(jnp.float32)
    K = jnp.asarray([[32.0, 0.0, 32.0],
                     [0.0, 32.0, 32.0],
                     [0.0, 0.0, 1.0]], dtype=jnp.float32)

    fwd = jax.jit(model_forward)
    loss, M, proj_t = jax.block_until_ready(fwd(T, vertices, K, image_ref))

    # --- correctness checks against pure numpy references ---
    M_ref = _se3_exp_reference(np.asarray(T))
    assert np.allclose(np.asarray(M), M_ref, rtol=1e-3, atol=1e-3), "se3_exp mismatch"

    vh_np = np.concatenate([np.asarray(vertices), np.ones((V, 1), np.float32)], axis=1)
    P_np = np.asarray(K) @ M_ref[0]
    pix_np = vh_np @ P_np.T
    pix_np = pix_np / pix_np[:, 2:3]
    proj = np.asarray(proj_t)[:, :V].T
    assert np.allclose(proj, pix_np, rtol=2e-2, atol=2e-2), "projection mismatch"

    loss_ref = float(np.sum((0.0 - np.asarray(image_ref)) ** 2))
    assert np.allclose(float(loss), loss_ref, rtol=1e-5, atol=1e-5), "loss mismatch"

    print("KERNEL_OK")
</pallas_src>

<mosaic_0001>
module attributes {stable_mosaic.version = 11 : i64} {
  func.func @_fused_forward_kernel(%arg0: memref<1x6xf32, #tpu.memory_space<vmem>>, %arg1: memref<3x3xf32, #tpu.memory_space<smem>>, %arg2: memref<8x128xf32, #tpu.memory_space<vmem>>, %arg3: memref<32x128xf32, #tpu.memory_space<vmem>>, %arg4: memref<8x128xf32, #tpu.memory_space<vmem>>, %arg5: memref<8x128xf32, #tpu.memory_space<vmem>>, %arg6: memref<1x1xf32, #tpu.memory_space<vmem>>) attributes {dimension_semantics = [], scalar_prefetch = 0 : i64, scratch_operands = 0 : i64, tpu.core_type = #tpu.core_type<tc>} {
    %c0 = arith.constant 0 : index
    %c0_0 = arith.constant 0 : index
    %0 = vector.load %arg0[%c0, %c0_0] : memref<1x6xf32, #tpu.memory_space<vmem>>, vector<1x6xf32>
    %1 = vector.extract_strided_slice %0 {offsets = [0, 0], sizes = [1, 1], strides = [1, 1]} : vector<1x6xf32> to vector<1x1xf32>
    %2 = vector.extract_strided_slice %0 {offsets = [0, 1], sizes = [1, 1], strides = [1, 1]} : vector<1x6xf32> to vector<1x1xf32>
    %3 = vector.extract_strided_slice %0 {offsets = [0, 2], sizes = [1, 1], strides = [1, 1]} : vector<1x6xf32> to vector<1x1xf32>
    %4 = vector.extract_strided_slice %0 {offsets = [0, 3], sizes = [1, 1], strides = [1, 1]} : vector<1x6xf32> to vector<1x1xf32>
    %5 = vector.extract_strided_slice %0 {offsets = [0, 4], sizes = [1, 1], strides = [1, 1]} : vector<1x6xf32> to vector<1x1xf32>
    %6 = vector.extract_strided_slice %0 {offsets = [0, 5], sizes = [1, 1], strides = [1, 1]} : vector<1x6xf32> to vector<1x1xf32>
    %7 = arith.mulf %4, %4 : vector<1x1xf32>
    %8 = arith.mulf %5, %5 : vector<1x1xf32>
    %9 = arith.addf %7, %8 : vector<1x1xf32>
    %10 = arith.mulf %6, %6 : vector<1x1xf32>
    %11 = arith.addf %9, %10 : vector<1x1xf32>
    %12 = math.sqrt %11 : vector<1x1xf32>
    %cst = arith.constant 9.99999974E-6 : f32
    %13 = vector.broadcast %cst : f32 to vector<1x1xf32>
    %14 = arith.addf %12, %13 : vector<1x1xf32>
    %cst_1 = arith.constant 1.000000e+00 : f32
    %15 = vector.broadcast %cst_1 : f32 to vector<1x1xf32>
    %16 = arith.divf %15, %14 : vector<1x1xf32>
    %17 = math.sin %14 : vector<1x1xf32>
    %18 = math.cos %14 : vector<1x1xf32>
    %19 = arith.mulf %17, %16 : vector<1x1xf32>
    %cst_2 = arith.constant 1.000000e+00 : f32
    %20 = vector.broadcast %cst_2 : f32 to vector<1x1xf32>
    %21 = arith.subf %20, %19 : vector<1x1xf32>
    %cst_3 = arith.constant 1.000000e+00 : f32
    %22 = vector.broadcast %cst_3 : f32 to vector<1x1xf32>
    %23 = arith.subf %22, %18 : vector<1x1xf32>
    %24 = arith.mulf %23, %16 : vector<1x1xf32>
    %25 = arith.mulf %4, %16 : vector<1x1xf32>
    %26 = arith.mulf %5, %16 : vector<1x1xf32>
    %27 = arith.mulf %6, %16 : vector<1x1xf32>
    %28 = arith.mulf %23, %25 : vector<1x1xf32>
    %29 = arith.mulf %28, %25 : vector<1x1xf32>
    %30 = arith.addf %18, %29 : vector<1x1xf32>
    %31 = arith.mulf %23, %25 : vector<1x1xf32>
    %32 = arith.mulf %31, %26 : vector<1x1xf32>
    %33 = arith.mulf %17, %27 : vector<1x1xf32>
    %34 = arith.subf %32, %33 : vector<1x1xf32>
    %35 = arith.mulf %23, %25 : vector<1x1xf32>
    %36 = arith.mulf %35, %27 : vector<1x1xf32>
    %37 = arith.mulf %17, %26 : vector<1x1xf32>
    %38 = arith.addf %36, %37 : vector<1x1xf32>
    %39 = arith.mulf %23, %26 : vector<1x1xf32>
    %40 = arith.mulf %39, %25 : vector<1x1xf32>
    %41 = arith.mulf %17, %27 : vector<1x1xf32>
    %42 = arith.addf %40, %41 : vector<1x1xf32>
    %43 = arith.mulf %23, %26 : vector<1x1xf32>
    %44 = arith.mulf %43, %26 : vector<1x1xf32>
    %45 = arith.addf %18, %44 : vector<1x1xf32>
    %46 = arith.mulf %23, %26 : vector<1x1xf32>
    %47 = arith.mulf %46, %27 : vector<1x1xf32>
    %48 = arith.mulf %17, %25 : vector<1x1xf32>
    %49 = arith.subf %47, %48 : vector<1x1xf32>
    %50 = arith.mulf %23, %27 : vector<1x1xf32>
    %51 = arith.mulf %50, %25 : vector<1x1xf32>
    %52 = arith.mulf %17, %26 : vector<1x1xf32>
    %53 = arith.subf %51, %52 : vector<1x1xf32>
    %54 = arith.mulf %23, %27 : vector<1x1xf32>
    %55 = arith.mulf %54, %26 : vector<1x1xf32>
    %56 = arith.mulf %17, %25 : vector<1x1xf32>
    %57 = arith.addf %55, %56 : vector<1x1xf32>
    %58 = arith.mulf %23, %27 : vector<1x1xf32>
    %59 = arith.mulf %58, %27 : vector<1x1xf32>
    %60 = arith.addf %18, %59 : vector<1x1xf32>
    %61 = arith.mulf %21, %25 : vector<1x1xf32>
    %62 = arith.mulf %61, %25 : vector<1x1xf32>
    %63 = arith.addf %19, %62 : vector<1x1xf32>
    %64 = arith.mulf %21, %25 : vector<1x1xf32>
    %65 = arith.mulf %64, %26 : vector<1x1xf32>
    %66 = arith.mulf %24, %27 : vector<1x1xf32>
    %67 = arith.subf %65, %66 : vector<1x1xf32>
    %68 = arith.mulf %21, %25 : vector<1x1xf32>
    %69 = arith.mulf %68, %27 : vector<1x1xf32>
    %70 = arith.mulf %24, %26 : vector<1x1xf32>
    %71 = arith.addf %69, %70 : vector<1x1xf32>
    %72 = arith.mulf %21, %26 : vector<1x1xf32>
    %73 = arith.mulf %72, %25 : vector<1x1xf32>
    %74 = arith.mulf %24, %27 : vector<1x1xf32>
    %75 = arith.addf %73, %74 : vector<1x1xf32>
    %76 = arith.mulf %21, %26 : vector<1x1xf32>
    %77 = arith.mulf %76, %26 : vector<1x1xf32>
    %78 = arith.addf %19, %77 : vector<1x1xf32>
    %79 = arith.mulf %21, %26 : vector<1x1xf32>
    %80 = arith.mulf %79, %27 : vector<1x1xf32>
    %81 = arith.mulf %24, %25 : vector<1x1xf32>
    %82 = arith.subf %80, %81 : vector<1x1xf32>
    %83 = arith.mulf %21, %27 : vector<1x1xf32>
    %84 = arith.mulf %83, %25 : vector<1x1xf32>
    %85 = arith.mulf %24, %26 : vector<1x1xf32>
    %86 = arith.subf %84, %85 : vector<1x1xf32>
    %87 = arith.mulf %21, %27 : vector<1x1xf32>
    %88 = arith.mulf %87, %26 : vector<1x1xf32>
    %89 = arith.mulf %24, %25 : vector<1x1xf32>
    %90 = arith.addf %88, %89 : vector<1x1xf32>
    %91 = arith.mulf %21, %27 : vector<1x1xf32>
    %92 = arith.mulf %91, %27 : vector<1x1xf32>
    %93 = arith.addf %19, %92 : vector<1x1xf32>
    %94 = arith.mulf %63, %1 : vector<1x1xf32>
    %95 = arith.mulf %67, %2 : vector<1x1xf32>
    %96 = arith.addf %94, %95 : vector<1x1xf32>
    %97 = arith.mulf %71, %3 : vector<1x1xf32>
    %98 = arith.addf %96, %97 : vector<1x1xf32>
    %99 = arith.mulf %75, %1 : vector<1x1xf32>
    %100 = arith.mulf %78, %2 : vector<1x1xf32>
    %101 = arith.addf %99, %100 : vector<1x1xf32>
    %102 = arith.mulf %82, %3 : vector<1x1xf32>
    %103 = arith.addf %101, %102 : vector<1x1xf32>
    %104 = arith.mulf %86, %1 : vector<1x1xf32>
    %105 = arith.mulf %90, %2 : vector<1x1xf32>
    %106 = arith.addf %104, %105 : vector<1x1xf32>
    %107 = arith.mulf %93, %3 : vector<1x1xf32>
    %108 = arith.addf %106, %107 : vector<1x1xf32>
    %109 = tpu.iota {dimensions = array<i32: 1>} : vector<8x128xi32>
    %c11_i32 = arith.constant 11 : i32
    %110 = vector.broadcast %c11_i32 : i32 to vector<8x128xi32>
    %111 = arith.cmpi eq, %109, %110 : vector<8x128xi32>
    %cst_4 = arith.constant 0.000000e+00 : f32
    %112 = vector.shape_cast %108 : vector<1x1xf32> to vector<1x1xf32>
    %113 = vector.broadcast %112 : vector<1x1xf32> to vector<8x128xf32>
    %114 = vector.broadcast %cst_4 : f32 to vector<8x128xf32>
    %115 = arith.select %111, %113, %114 : vector<8x128xi1>, vector<8x128xf32>
    %c10_i32 = arith.constant 10 : i32
    %116 = vector.broadcast %c10_i32 : i32 to vector<8x128xi32>
    %117 = arith.cmpi eq, %109, %116 : vector<8x128xi32>
    %118 = vector.shape_cast %60 : vector<1x1xf32> to vector<1x1xf32>
    %119 = vector.broadcast %118 : vector<1x1xf32> to vector<8x128xf32>
    %120 = arith.select %117, %119, %115 : vector<8x128xi1>, vector<8x128xf32>
    %c9_i32 = arith.constant 9 : i32
    %121 = vector.broadcast %c9_i32 : i32 to vector<8x128xi32>
    %122 = arith.cmpi eq, %109, %121 : vector<8x128xi32>
    %123 = vector.shape_cast %57 : vector<1x1xf32> to vector<1x1xf32>
    %124 = vector.broadcast %123 : vector<1x1xf32> to vector<8x128xf32>
    %125 = arith.select %122, %124, %120 : vector<8x128xi1>, vector<8x128xf32>
    %c8_i32 = arith.constant 8 : i32
    %126 = vector.broadcast %c8_i32 : i32 to vector<8x128xi32>
    %127 = arith.cmpi eq, %109, %126 : vector<8x128xi32>
    %128 = vector.shape_cast %53 : vector<1x1xf32> to vector<1x1xf32>
    %129 = vector.broadcast %128 : vector<1x1xf32> to vector<8x128xf32>
    %130 = arith.select %127, %129, %125 : vector<8x128xi1>, vector<8x128xf32>
    %c7_i32 = arith.constant 7 : i32
    %131 = vector.broadcast %c7_i32 : i32 to vector<8x128xi32>
    %132 = arith.cmpi eq, %109, %131 : vector<8x128xi32>
    %133 = vector.shape_cast %103 : vector<1x1xf32> to vector<1x1xf32>
    %134 = vector.broadcast %133 : vector<1x1xf32> to vector<8x128xf32>
    %135 = arith.select %132, %134, %130 : vector<8x128xi1>, vector<8x128xf32>
    %c6_i32 = arith.constant 6 : i32
    %136 = vector.broadcast %c6_i32 : i32 to vector<8x128xi32>
    %137 = arith.cmpi eq, %109, %136 : vector<8x128xi32>
    %138 = vector.shape_cast %49 : vector<1x1xf32> to vector<1x1xf32>
    %139 = vector.broadcast %138 : vector<1x1xf32> to vector<8x128xf32>
    %140 = arith.select %137, %139, %135 : vector<8x128xi1>, vector<8x128xf32>
    %c5_i32 = arith.constant 5 : i32
    %141 = vector.broadcast %c5_i32 : i32 to vector<8x128xi32>
    %142 = arith.cmpi eq, %109, %141 : vector<8x128xi32>
    %143 = vector.shape_cast %45 : vector<1x1xf32> to vector<1x1xf32>
    %144 = vector.broadcast %143 : vector<1x1xf32> to vector<8x128xf32>
    %145 = arith.select %142, %144, %140 : vector<8x128xi1>, vector<8x128xf32>
    %c4_i32 = arith.constant 4 : i32
    %146 = vector.broadcast %c4_i32 : i32 to vector<8x128xi32>
    %147 = arith.cmpi eq, %109, %146 : vector<8x128xi32>
    %148 = vector.shape_cast %42 : vector<1x1xf32> to vector<1x1xf32>
    %149 = vector.broadcast %148 : vector<1x1xf32> to vector<8x128xf32>
    %150 = arith.select %147, %149, %145 : vector<8x128xi1>, vector<8x128xf32>
    %c3_i32 = arith.constant 3 : i32
    %151 = vector.broadcast %c3_i32 : i32 to vector<8x128xi32>
    %152 = arith.cmpi eq, %109, %151 : vector<8x128xi32>
    %153 = vector.shape_cast %98 : vector<1x1xf32> to vector<1x1xf32>
    %154 = vector.broadcast %153 : vector<1x1xf32> to vector<8x128xf32>
    %155 = arith.select %152, %154, %150 : vector<8x128xi1>, vector<8x128xf32>
    %c2_i32 = arith.constant 2 : i32
    %156 = vector.broadcast %c2_i32 : i32 to vector<8x128xi32>
    %157 = arith.cmpi eq, %109, %156 : vector<8x128xi32>
    %158 = vector.shape_cast %38 : vector<1x1xf32> to vector<1x1xf32>
    %159 = vector.broadcast %158 : vector<1x1xf32> to vector<8x128xf32>
    %160 = arith.select %157, %159, %155 : vector<8x128xi1>, vector<8x128xf32>
    %c1_i32 = arith.constant 1 : i32
    %161 = vector.broadcast %c1_i32 : i32 to vector<8x128xi32>
    %162 = arith.cmpi eq, %109, %161 : vector<8x128xi32>
    %163 = vector.shape_cast %34 : vector<1x1xf32> to vector<1x1xf32>
    %164 = vector.broadcast %163 : vector<1x1xf32> to vector<8x128xf32>
    %165 = arith.select %162, %164, %160 : vector<8x128xi1>, vector<8x128xf32>
    %c0_i32 = arith.constant 0 : i32
    %166 = vector.broadcast %c0_i32 : i32 to vector<8x128xi32>
    %167 = arith.cmpi eq, %109, %166 : vector<8x128xi32>
    %168 = vector.shape_cast %30 : vector<1x1xf32> to vector<1x1xf32>
    %169 = vector.broadcast %168 : vector<1x1xf32> to vector<8x128xf32>
    %170 = arith.select %167, %169, %165 : vector<8x128xi1>, vector<8x128xf32>
    %c0_5 = arith.constant 0 : index
    %c0_6 = arith.constant 0 : index
    %171 = vector.load %arg4[%c0_5, %c0_6] : memref<8x128xf32, #tpu.memory_space<vmem>>, vector<8x128xf32>
    tpu.vector_store %arg4[%c0_5, %c0_6], %170 {strides = array<i32>} : memref<8x128xf32, #tpu.memory_space<vmem>>, vector<8x128xf32>,
    %c0_7 = arith.constant 0 : index
    %c0_8 = arith.constant 0 : index
    %172 = memref.load %arg1[%c0_7, %c0_8] : memref<3x3xf32, #tpu.memory_space<smem>>
    %c0_9 = arith.constant 0 : index
    %c1 = arith.constant 1 : index
    %173 = memref.load %arg1[%c0_9, %c1] : memref<3x3xf32, #tpu.memory_space<smem>>
    %c0_10 = arith.constant 0 : index
    %c2 = arith.constant 2 : index
    %174 = memref.load %arg1[%c0_10, %c2] : memref<3x3xf32, #tpu.memory_space<smem>>
    %c1_11 = arith.constant 1 : index
    %c0_12 = arith.constant 0 : index
    %175 = memref.load %arg1[%c1_11, %c0_12] : memref<3x3xf32, #tpu.memory_space<smem>>
    %c1_13 = arith.constant 1 : index
    %c1_14 = arith.constant 1 : index
    %176 = memref.load %arg1[%c1_13, %c1_14] : memref<3x3xf32, #tpu.memory_space<smem>>
    %c1_15 = arith.constant 1 : index
    %c2_16 = arith.constant 2 : index
    %177 = memref.load %arg1[%c1_15, %c2_16] : memref<3x3xf32, #tpu.memory_space<smem>>
    %c2_17 = arith.constant 2 : index
    %c0_18 = arith.constant 0 : index
    %178 = memref.load %arg1[%c2_17, %c0_18] : memref<3x3xf32, #tpu.memory_space<smem>>
    %c2_19 = arith.constant 2 : index
    %c1_20 = arith.constant 1 : index
    %179 = memref.load %arg1[%c2_19, %c1_20] : memref<3x3xf32, #tpu.memory_space<smem>>
    %c2_21 = arith.constant 2 : index
    %c2_22 = arith.constant 2 : index
    %180 = memref.load %arg1[%c2_21, %c2_22] : memref<3x3xf32, #tpu.memory_space<smem>>
    %181 = vector.broadcast %172 : f32 to vector<1x1xf32>
    %182 = arith.mulf %181, %30 : vector<1x1xf32>
    %183 = vector.broadcast %173 : f32 to vector<1x1xf32>
    %184 = arith.mulf %183, %42 : vector<1x1xf32>
    %185 = arith.addf %182, %184 : vector<1x1xf32>
    %186 = vector.broadcast %174 : f32 to vector<1x1xf32>
    %187 = arith.mulf %186, %53 : vector<1x1xf32>
    %188 = arith.addf %185, %187 : vector<1x1xf32>
    %189 = vector.broadcast %172 : f32 to vector<1x1xf32>
    %190 = arith.mulf %189, %34 : vector<1x1xf32>
    %191 = vector.broadcast %173 : f32 to vector<1x1xf32>
    %192 = arith.mulf %191, %45 : vector<1x1xf32>
    %193 = arith.addf %190, %192 : vector<1x1xf32>
    %194 = vector.broadcast %174 : f32 to vector<1x1xf32>
    %195 = arith.mulf %194, %57 : vector<1x1xf32>
    %196 = arith.addf %193, %195 : vector<1x1xf32>
    %197 = vector.broadcast %172 : f32 to vector<1x1xf32>
    %198 = arith.mulf %197, %38 : vector<1x1xf32>
    %199 = vector.broadcast %173 : f32 to vector<1x1xf32>
    %200 = arith.mulf %199, %49 : vector<1x1xf32>
    %201 = arith.addf %198, %200 : vector<1x1xf32>
    %202 = vector.broadcast %174 : f32 to vector<1x1xf32>
    %203 = arith.mulf %202, %60 : vector<1x1xf32>
    %204 = arith.addf %201, %203 : vector<1x1xf32>
    %205 = vector.broadcast %172 : f32 to vector<1x1xf32>
    %206 = arith.mulf %205, %98 : vector<1x1xf32>
    %207 = vector.broadcast %173 : f32 to vector<1x1xf32>
    %208 = arith.mulf %207, %103 : vector<1x1xf32>
    %209 = arith.addf %206, %208 : vector<1x1xf32>
    %210 = vector.broadcast %174 : f32 to vector<1x1xf32>
    %211 = arith.mulf %210, %108 : vector<1x1xf32>
    %212 = arith.addf %209, %211 : vector<1x1xf32>
    %213 = vector.broadcast %175 : f32 to vector<1x1xf32>
    %214 = arith.mulf %213, %30 : vector<1x1xf32>
    %215 = vector.broadcast %176 : f32 to vector<1x1xf32>
    %216 = arith.mulf %215, %42 : vector<1x1xf32>
    %217 = arith.addf %214, %216 : vector<1x1xf32>
    %218 = vector.broadcast %177 : f32 to vector<1x1xf32>
    %219 = arith.mulf %218, %53 : vector<1x1xf32>
    %220 = arith.addf %217, %219 : vector<1x1xf32>
    %221 = vector.broadcast %175 : f32 to vector<1x1xf32>
    %222 = arith.mulf %221, %34 : vector<1x1xf32>
    %223 = vector.broadcast %176 : f32 to vector<1x1xf32>
    %224 = arith.mulf %223, %45 : vector<1x1xf32>
    %225 = arith.addf %222, %224 : vector<1x1xf32>
    %226 = vector.broadcast %177 : f32 to vector<1x1xf32>
    %227 = arith.mulf %226, %57 : vector<1x1xf32>
    %228 = arith.addf %225, %227 : vector<1x1xf32>
    %229 = vector.broadcast %175 : f32 to vector<1x1xf32>
    %230 = arith.mulf %229, %38 : vector<1x1xf32>
    %231 = vector.broadcast %176 : f32 to vector<1x1xf32>
    %232 = arith.mulf %231, %49 : vector<1x1xf32>
    %233 = arith.addf %230, %232 : vector<1x1xf32>
    %234 = vector.broadcast %177 : f32 to vector<1x1xf32>
    %235 = arith.mulf %234, %60 : vector<1x1xf32>
    %236 = arith.addf %233, %235 : vector<1x1xf32>
    %237 = vector.broadcast %175 : f32 to vector<1x1xf32>
    %238 = arith.mulf %237, %98 : vector<1x1xf32>
    %239 = vector.broadcast %176 : f32 to vector<1x1xf32>
    %240 = arith.mulf %239, %103 : vector<1x1xf32>
    %241 = arith.addf %238, %240 : vector<1x1xf32>
    %242 = vector.broadcast %177 : f32 to vector<1x1xf32>
    %243 = arith.mulf %242, %108 : vector<1x1xf32>
    %244 = arith.addf %241, %243 : vector<1x1xf32>
    %245 = vector.broadcast %178 : f32 to vector<1x1xf32>
    %246 = arith.mulf %245, %30 : vector<1x1xf32>
    %247 = vector.broadcast %179 : f32 to vector<1x1xf32>
    %248 = arith.mulf %247, %42 : vector<1x1xf32>
    %249 = arith.addf %246, %248 : vector<1x1xf32>
    %250 = vector.broadcast %180 : f32 to vector<1x1xf32>
    %251 = arith.mulf %250, %53 : vector<1x1xf32>
    %252 = arith.addf %249, %251 : vector<1x1xf32>
    %253 = vector.broadcast %178 : f32 to vector<1x1xf32>
    %254 = arith.mulf %253, %34 : vector<1x1xf32>
    %255 = vector.broadcast %179 : f32 to vector<1x1xf32>
    %256 = arith.mulf %255, %45 : vector<1x1xf32>
    %257 = arith.addf %254, %256 : vector<1x1xf32>
    %258 = vector.broadcast %180 : f32 to vector<1x1xf32>
    %259 = arith.mulf %258, %57 : vector<1x1xf32>
    %260 = arith.addf %257, %259 : vector<1x1xf32>
    %261 = vector.broadcast %178 : f32 to vector<1x1xf32>
    %262 = arith.mulf %261, %38 : vector<1x1xf32>
    %263 = vector.broadcast %179 : f32 to vector<1x1xf32>
    %264 = arith.mulf %263, %49 : vector<1x1xf32>
    %265 = arith.addf %262, %264 : vector<1x1xf32>
    %266 = vector.broadcast %180 : f32 to vector<1x1xf32>
    %267 = arith.mulf %266, %60 : vector<1x1xf32>
    %268 = arith.addf %265, %267 : vector<1x1xf32>
    %269 = vector.broadcast %178 : f32 to vector<1x1xf32>
    %270 = arith.mulf %269, %98 : vector<1x1xf32>
    %271 = vector.broadcast %179 : f32 to vector<1x1xf32>
    %272 = arith.mulf %271, %103 : vector<1x1xf32>
    %273 = arith.addf %270, %272 : vector<1x1xf32>
    %274 = vector.broadcast %180 : f32 to vector<1x1xf32>
    %275 = arith.mulf %274, %108 : vector<1x1xf32>
    %276 = arith.addf %273, %275 : vector<1x1xf32>
    %c0_23 = arith.constant 0 : index
    %c0_24 = arith.constant 0 : index
    %277 = vector.load %arg2[%c0_23, %c0_24] : memref<8x128xf32, #tpu.memory_space<vmem>>, vector<8x128xf32>
    %278 = vector.extract_strided_slice %277 {offsets = [0, 0], sizes = [1, 128], strides = [1, 1]} : vector<8x128xf32> to vector<1x128xf32>
    %279 = vector.extract_strided_slice %277 {offsets = [1, 0], sizes = [1, 128], strides = [1, 1]} : vector<8x128xf32> to vector<1x128xf32>
    %280 = vector.extract_strided_slice %277 {offsets = [2, 0], sizes = [1, 128], strides = [1, 1]} : vector<8x128xf32> to vector<1x128xf32>
    %281 = vector.broadcast %188 : vector<1x1xf32> to vector<1x128xf32>
    %282 = arith.mulf %281, %278 : vector<1x128xf32>
    %283 = vector.broadcast %196 : vector<1x1xf32> to vector<1x128xf32>
    %284 = arith.mulf %283, %279 : vector<1x128xf32>
    %285 = arith.addf %282, %284 : vector<1x128xf32>
    %286 = vector.broadcast %204 : vector<1x1xf32> to vector<1x128xf32>
    %287 = arith.mulf %286, %280 : vector<1x128xf32>
    %288 = arith.addf %285, %287 : vector<1x128xf32>
    %289 = vector.broadcast %212 : vector<1x1xf32> to vector<1x128xf32>
    %290 = arith.addf %288, %289 : vector<1x128xf32>
    %291 = vector.broadcast %220 : vector<1x1xf32> to vector<1x128xf32>
    %292 = arith.mulf %291, %278 : vector<1x128xf32>
    %293 = vector.broadcast %228 : vector<1x1xf32> to vector<1x128xf32>
    %294 = arith.mulf %293, %279 : vector<1x128xf32>
    %295 = arith.addf %292, %294 : vector<1x128xf32>
    %296 = vector.broadcast %236 : vector<1x1xf32> to vector<1x128xf32>
    %297 = arith.mulf %296, %280 : vector<1x128xf32>
    %298 = arith.addf %295, %297 : vector<1x128xf32>
    %299 = vector.broadcast %244 : vector<1x1xf32> to vector<1x128xf32>
    %300 = arith.addf %298, %299 : vector<1x128xf32>
    %301 = vector.broadcast %252 : vector<1x1xf32> to vector<1x128xf32>
    %302 = arith.mulf %301, %278 : vector<1x128xf32>
    %303 = vector.broadcast %260 : vector<1x1xf32> to vector<1x128xf32>
    %304 = arith.mulf %303, %279 : vector<1x128xf32>
    %305 = arith.addf %302, %304 : vector<1x128xf32>
    %306 = vector.broadcast %268 : vector<1x1xf32> to vector<1x128xf32>
    %307 = arith.mulf %306, %280 : vector<1x128xf32>
    %308 = arith.addf %305, %307 : vector<1x128xf32>
    %309 = vector.broadcast %276 : vector<1x1xf32> to vector<1x128xf32>
    %310 = arith.addf %308, %309 : vector<1x128xf32>
    %311 = tpu.reciprocal %310 {approx = true} : vector<1x128xf32> -> vector<1x128xf32>
    %312 = tpu.iota {dimensions = array<i32: 0>} : vector<8x128xi32>
    %c0_i32_25 = arith.constant 0 : i32
    %313 = vector.broadcast %c0_i32_25 : i32 to vector<8x128xi32>
    %314 = arith.cmpi eq, %312, %313 : vector<8x128xi32>
    %315 = arith.mulf %290, %311 : vector<1x128xf32>
    %c1_i32_26 = arith.constant 1 : i32
    %316 = vector.broadcast %c1_i32_26 : i32 to vector<8x128xi32>
    %317 = arith.cmpi eq, %312, %316 : vector<8x128xi32>
    %318 = arith.mulf %300, %311 : vector<1x128xf32>
    %c2_i32_27 = arith.constant 2 : i32
    %319 = vector.broadcast %c2_i32_27 : i32 to vector<8x128xi32>
    %320 = arith.cmpi eq, %312, %319 : vector<8x128xi32>
    %cst_28 = arith.constant 1.000000e+00 : f32
    %cst_29 = arith.constant 0.000000e+00 : f32
    %321 = vector.broadcast %cst_28 : f32 to vector<8x128xf32>
    %322 = vector.broadcast %cst_29 : f32 to vector<8x128xf32>
    %323 = arith.select %320, %321, %322 : vector<8x128xi1>, vector<8x128xf32>
    %324 = vector.shape_cast %318 : vector<1x128xf32> to vector<1x128xf32>
    %325 = vector.broadcast %324 : vector<1x128xf32> to vector<8x128xf32>
    %326 = arith.select %317, %325, %323 : vector<8x128xi1>, vector<8x128xf32>
    %327 = vector.shape_cast %315 : vector<1x128xf32> to vector<1x128xf32>
    %328 = vector.broadcast %327 : vector<1x128xf32> to vector<8x128xf32>
    %329 = arith.select %314, %328, %326 : vector<8x128xi1>, vector<8x128xf32>
    %c0_30 = arith.constant 0 : index
    %c0_31 = arith.constant 0 : index
    %330 = vector.load %arg5[%c0_30, %c0_31] : memref<8x128xf32, #tpu.memory_space<vmem>>, vector<8x128xf32>
    tpu.vector_store %arg5[%c0_30, %c0_31], %329 {strides = array<i32>} : memref<8x128xf32, #tpu.memory_space<vmem>>, vector<8x128xf32>,
    %c0_32 = arith.constant 0 : index
    %c0_33 = arith.constant 0 : index
    %331 = vector.load %arg3[%c0_32, %c0_33] : memref<32x128xf32, #tpu.memory_space<vmem>>, vector<32x128xf32>
    %332 = arith.mulf %331, %331 : vector<32x128xf32>
    %cst_34 = arith.constant dense<0.000000e+00> : vector<128xf32>
    %333 = vector.multi_reduction <add>, %332, %cst_34 [0] : vector<32x128xf32> to vector<128xf32>
    %334 = vector.shape_cast %333 : vector<128xf32> to vector<1x128xf32>
    %cst_35 = arith.constant dense<0.000000e+00> : vector<1xf32>
    %335 = vector.multi_reduction <add>, %334, %cst_35 [1] : vector<1x128xf32> to vector<1xf32>
    %336 = vector.shape_cast %335 : vector<1xf32> to vector<1x1xf32>
    %c0_36 = arith.constant 0 : index
    %c0_37 = arith.constant 0 : index
    %337 = vector.load %arg6[%c0_36, %c0_37] : memref<1x1xf32, #tpu.memory_space<vmem>>, vector<1x1xf32>
    tpu.vector_store %arg6[%c0_36, %c0_37], %336 {strides = array<i32>} : memref<1x1xf32, #tpu.memory_space<vmem>>, vector<1x1xf32>,
    return
  }
}

</mosaic_0001>

<bundles_post_ra>
// kernel: squeeze.0
= control target key start
LH: loop header
LB: loop body
LE: loop exit
PB: predicated region body
PF: predicated region fallthrough
CT: control target
= control target key end

     0   :  { %s100_s0 = inlined_call_operand.vmem [shape: f32[12], index: 0, kind: input, shape index: {}]   ;;  %s101_s1 = inlined_call_operand.hbm [shape: f32[1,3,4], index: 1, kind: output, shape index: {}]  }
   0x1   :  { %v5_v0 = vld [vmem:[%s100_s0] sm:$0x1] }
   0x2   :  { %6 = vst [vmem:[#allocation3] sm:$0x1] %v5_v0 }
   0x3   :  { %2 = vsyncpa [#allocation1], 0  ;;  %s81_s0 = smov 124   ;;  %s82_s8 = smov 120   ;;  %vm8_vm0 = vcmask 31744  }
   0x4   :  { %s83_s9 = smov [#allocation0]   ;;  %s45_s1 = sshll.u32 %s101_s1, 4  ;;  %s46_s1 = int_to_ptr.hbm [resolvable:$true] %s45_s1 }
   0x5   :  { %s43_s10 = sshll.u32 %s83_s9, 4  ;;  %s44_s10 = int_to_ptr.vmem [resolvable:$true] %s43_s10 }
   0x9   :  { %v10_v1 = vld [vmem:[#allocation3] sm:$0x1]  }
   0xa   :  { %11 = vrot.lane.b32.xlu0 %v10_v1, %s81_s0  ;;  %v16_v2 = vld [vmem:[#allocation3] sm:$0x1]  }
   0xb   :  { %v7_v3 = vld [vmem:[#allocation3] sm:$0x1]  }
   0xc   :  { %9 = vst.msk [vmem:[#allocation2] sm:$0x1] %vm8_vm0, %v7_v3  }
  0x12   :  { %17 = vrot.lane.b32.xlu0 %v16_v2, %s82_s8 }
  0x13   :  { %v24_v4 = vld [vmem:[#allocation2] sm:$0x1] }
  0x14   :  { %27 = vst [vmem:[#allocation0] sm:$0x1] %v24_v4 }
  0x7c   :  { %v12_v5 = vpop.permute.xlu0 %11  }
  0x7d   :  { %15 = vst.msk [vmem:[#allocation2 + $0x8] sm:$0x1] %vm8_vm0, %v12_v5  }
  0x84   :  { %v29_v6 = vld [vmem:[#allocation2 + $0x8] sm:$0x1]  ;;  %v18_v7 = vpop.permute.xlu0 %17  }
  0x85   :  { %33 = vst [vmem:[#allocation0 + $0x1] sm:$0x1] %v29_v6 }
  0x86   :  { %21 = vst.msk [vmem:[#allocation2 + $0x10] sm:$0x1] %vm8_vm0, %v18_v7  }
  0x8d   :  { %v35_v8 = vld [vmem:[#allocation2 + $0x10] sm:$0x1] }
  0x8e   :  { %39 = vst [vmem:[#allocation0 + $0x2] sm:$0x1] %v35_v8 }
  0x8f   :  { %48 = dma.vmem_to_hbm [thread:$0]  %s44_s10, 48, %s46_s1, [#allocation1]  }
  0x90   :  { %79 = dma.done.wait [#allocation1], 48  }
  0x91   :  { %80 = vsyncadd [#allocation1], 4294967248 }
  0x92   :  { %51 = vsyncpa [#allocation1], 1 }

// kernel: model_forward.1
= control target key start
LH: loop header
LB: loop body
LE: loop exit
PB: predicated region body
PF: predicated region fallthrough
CT: control target
= control target key end

     0   :  { %12 = vsyncpa [#allocation4], 0  ;;  %s1282_s0 = inlined_call_operand.vmem [shape: f32[1,6], index: 0, kind: input, shape index: {}]   ;;  %s1283_s1 = inlined_call_operand.vmem [shape: f32[3,3], index: 1, kind: input, shape index: {}]   ;;  %s1284_s2 = inlined_call_operand.vmem [shape: f32[8,128], index: 2, kind: input, shape index: {}]   ;;  %s1285_s3 = inlined_call_operand.vmem [shape: f32[32,128], index: 3, kind: input, shape index: {}]   ;;  %s1286_s4 = inlined_call_operand.vmem [shape: f32[8,128], index: 4, kind: output, shape index: {0}]   ;;  %s1287_s5 = inlined_call_operand.vmem [shape: f32[8,128], index: 5, kind: output, shape index: {1}]   ;;  %s1288_s6 = inlined_call_operand.hbm [shape: f32[1,1], index: 6, kind: output, shape index: {2}]  }
   0x1   :  { %13 = vsyncpa [#allocation3], 0  ;;  %s21_s23 = sshll.u32 %s1283_s1, 4  ;;  %s902_s24 = smov [#allocation2]   ;;  %s22_s23 = int_to_ptr.vmem [resolvable:$true] %s21_s23 }
   0x2   :  { %24 = dma.vmem_to_smem %s22_s23, 64, %s902_s24, [#allocation4]  }
   0x3   :  { %898 = dma.done.wait [#allocation4], 64  }
   0x4   :  { %899 = vsyncadd [#allocation4], 4294967232 }
   0x5   :  { %33 = sfence }
   0x6   :  { %v959_v0 = vld [vmem:[%s1282_s0] sm:$0x1]  ;;  %s903_s27 = smov 127   ;;  %s904_s28 = smov 126   ;;  %v907_v35 = vmov 683565275  }
   0x7   :  { %v35_v1 = vmul.f32 %v959_v0, %v959_v0  ;;  %s905_s1 = smov 3   ;;  %s906_s29 = smov 1   ;;  %v908_v37 = vmov 2475754826   ;;  %v909_v39 = vmov 2131351028  }
   0x8   :  { %462 = vrot.lane.b32.xlu2 %v959_v0, %s906_s29  ;;  %v910_v41 = vmov 2102212464   ;;  %v911_v46 = vmov 920167782   ;;  %v912_v51 = vmov 1326507024  }
   0x9   :  { %37 = vrot.lane.b32.xlu0 %v35_v1, %s903_s27  ;;  %s913_s0 = smov 2   ;;  %s834_s30 = sld [smem:[#allocation2 + $0x100]] }
   0xa   :  { %s1072_s7 = sld [smem:[#allocation2]]  ;;  %s917_s26 = smov [#allocation5]  }
   0xb   :  { %s1078_s8 = sld [smem:[#allocation2 + $0x102]] }
   0xc   :  { %s1090_s9 = sld [smem:[#allocation2 + $0x101]] }
   0xd   :  { %s1097_s10 = sld [smem:[#allocation2 + $0x2]] }
   0xe   :  { %s1109_s11 = sld [smem:[#allocation2 + $0x1]] }
   0xf   :  { %s1136_s12 = sld [smem:[#allocation2 + $0x80]] }
  0x10   :  { %s832_s13 = sld [smem:[#allocation2 + $0x81]] }
  0x11   :  { %41 = vrot.lane.b32.xlu0 %v35_v1, %s904_s28  ;;  %s833_s14 = sld [smem:[#allocation2 + $0x82]] }
  0x19   :  { %453 = vrot.lane.b32.xlu0 %v959_v0, %s905_s1 }
  0x7b   :  { %v38_v2 = vpop.permute.xlu0 %37 }
  0x7c   :  { %v40_v3 = vadd.f32 %v38_v2, %v35_v1 }
  0x83   :  { %v42_v4 = vpop.permute.xlu0 %41 }
  0x84   :  { %v44_v5 = vadd.f32 %v42_v4, %v40_v3 }
  0x86   :  { %856 = vrsqrt.f32 %v44_v5  ;;  %vm52_vm0 = vcmp.eq.f32.partialorder %v44_v5, inf  ;;  %v55_v13 = vand.u32 2147483648, %v44_v5  ;;  %vm54_vm1 = vcmp.eq.f32.partialorder %v44_v5, 0.0 }
  0x8c   :  { %v857_v6 = vpop.eup %856 }
  0x8d   :  { %v46_v7 = vmul.f32 %v857_v6, %v44_v5 }
  0x8f   :  { %v47_v8 = vmul.f32 %v857_v6, %v46_v7 }
  0x91   :  { %v48_v9 = vmul.f32 0.5, %v47_v8 }
  0x93   :  { %v49_v10 = vsub.f32 1.5, %v48_v9 }
  0x95   :  { %v50_v11 = vmul.f32 %v857_v6, %v49_v10 }
  0x97   :  { %v51_v12 = vmul.f32 %v50_v11, %v44_v5 }
  0x99   :  { %v53_v14 = vsel %vm52_vm0, %v44_v5, %v51_v12 }
  0x9a   :  { %v56_v15 = vsel %vm54_vm1, %v55_v13, %v53_v14 }
  0x9b   :  { %v968_v16 = vadd.f32 1e-05, %v56_v15 }
  0x9d   :  { %858 = vrcp.f32 %v968_v16  ;;  %v76_v17 = vand.u32 2139095040, %v968_v16  ;;  %v973_v19 = vand.u32 2147483647, %v968_v16  ;;  %v69_v24 = vand.u32 2147483648, %v968_v16 }
  0x9e   :  { %vm63_vm4 = vweird.f32 %v968_v16 }
  0x9f   :  { %v77_v18 = vshrl.u32 %v76_v17, 23  ;;  %v80_v26 = vand.u32 8388607, %v973_v19  ;;  %vm68_vm5 = vcmp.eq.f32.partialorder %v973_v19, 8.507059e+37  ;;  %v70_v30 = vor.u32 1.1754944e-38, %v69_v24 }
  0xa0   :  { %v914_v24 = vmov 0  }
  0xa1   :  { %v823_v20 = vadd.s32 4294967169, %v77_v18  ;;  %v81_v32 = vor.u32 8388608, %v80_v26 }
  0xa3   :  { %v859_v21 = vpop.eup %858  ;;  %v83_v23 = vadd.s32 1, %v823_v20  ;;  %v996_v55 = vshll.u32 %v81_v32, 8 }
  0xa4   :  { %v59_v22 = vmul.f32 %v859_v21, %v968_v16  ;;  %vm64_vm3 = vweird.f32 %v859_v21 }
  0xa5   :  { %vm84_vm2 = vcmp.gt.s32.totalorder %v83_v23, 0  ;;  %vm65_vm6 = vmor %vm63_vm4, %vm64_vm3  ;;  %v122_v4 = vand.u32 65535, %v996_v55  ;;  %v123_v5 = vshrl.u32 %v996_v55, 16  ;;  %vm74_vm3 = vcmp.le.f32.partialorder %v973_v19, 0.7853982 }
  0xa6   :  { %v60_v25 = vsub.f32 1.0, %v59_v22  ;;  %v85_v27 = vsel %vm84_vm2, %v83_v23, 0  ;;  %vm75_vm2 = vcmp.lt.s32.totalorder %v968_v16, 0 }
  0xa7   :  { %v87_v29 = vand.u32 31, %v85_v27  ;;  %v980_v33 = vshrl.u32 %v85_v27, 5 }
  0xa8   :  { %v61_v28 = vmul.f32 %v859_v21, %v60_v25 }
  0xa9   :  { %v982_v34 = vsub.s32 32, %v87_v29  ;;  %v90_v36 = vshll.u32 %v907_v35, %v87_v29  ;;  %v93_v38 = vshll.u32 %v908_v37, %v87_v29  ;;  %v96_v40 = vshll.u32 %v909_v39, %v87_v29 }
  0xaa   :  { %v62_v31 = vadd.f32 %v859_v21, %v61_v28  ;;  %v99_v42 = vshll.u32 %v910_v41, %v87_v29  ;;  %v102_v47 = vshll.u32 %v911_v46, %v87_v29  ;;  %vm105_vm7 = vcmp.lt.s32.totalorder %v980_v33, 1 }
  0xab   :  { %v91_v44 = vshrl.u32 %v908_v37, %v982_v34  ;;  %v94_v45 = vshrl.u32 %v909_v39, %v982_v34  ;;  %v97_v49 = vshrl.u32 %v910_v41, %v982_v34  ;;  %v100_v50 = vshrl.u32 %v911_v46, %v982_v34 }
  0xac   :  { %v66_v43 = vsel %vm65_vm6, %v859_v21, %v62_v31  ;;  %v103_v52 = vshrl.u32 %v912_v51, %v982_v34  ;;  %vm108_vm8 = vcmp.lt.s32.totalorder %v980_v33, 4  ;;  %vm107_vm9 = vcmp.lt.s32.totalorder %v980_v33, 3 }
  0xad   :  { %v991_v48 = vsel %vm68_vm5, %v70_v30, %v66_v43  ;;  %v92_v53 = vor.u32 %v91_v44, %v90_v36  ;;  %v95_v54 = vor.u32 %v94_v45, %v93_v38  ;;  %v98_v56 = vor.u32 %v97_v49, %v96_v40 }
  0xae   :  { %388 = vrot.lane.b32.xlu1 %v991_v48, %s906_s29  ;;  %v101_v57 = vor.u32 %v100_v50, %v99_v42  ;;  %v104_v58 = vor.u32 %v103_v52, %v102_v47  ;;  %vm106_vm10 = vcmp.lt.s32.totalorder %v980_v33, 2  ;;  %v89_v36 = vshrl.u32 %v907_v35, %v982_v34  ;;  %s809_s29 = sshll.u32 %s1288_s6, 4  ;;  %s810_s29 = int_to_ptr.hbm [resolvable:$true] %s809_s29 }
  0xaf   :  { %v113_v59 = vsel %vm105_vm7, %v92_v53, %v95_v54  ;;  %v117_v61 = vsel %vm105_vm7, %v95_v54, %v98_v56  ;;  %v110_v30 = vsel %vm108_vm8, %v98_v56, 2102212464 }
  0xb0   :  { %v114_v60 = vsel %vm108_vm8, %v101_v57, 920167782  ;;  %v118_v62 = vsel %vm108_vm8, %v104_v58, 1326507024  ;;  %v109_v42 = vsel %vm105_vm7, %v89_v36, %v92_v53  ;;  %v111_v43 = vsel %vm107_vm9, %v95_v54, %v110_v30 }
  0xb1   :  { %v115_v63 = vsel %vm107_vm9, %v98_v56, %v114_v60  ;;  %v119_v1 = vsel %vm107_vm9, %v101_v57, %v118_v62  ;;  %v112_v34 = vsel %vm106_vm10, %v109_v42, %v111_v43 }
  0xb2   :  { %v116_v2 = vsel %vm106_vm10, %v113_v59, %v115_v63  ;;  %v120_v3 = vsel %vm106_vm10, %v117_v61, %v119_v1  ;;  %v166_v52 = vmul.u32 %v996_v55, %v112_v34  ;;  %v1045_v34 = vmul.f32 %v991_v48, %v959_v0 }
  0xb3   :  { %v124_v6 = vand.u32 65535, %v120_v3  ;;  %v125_v7 = vshrl.u32 %v120_v3, 16  ;;  %v146_v8 = vand.u32 65535, %v116_v2  ;;  %v147_v9 = vshrl.u32 %v116_v2, 16 }
  0xb5   :  { %v127_v10 = vmul.u32 %v125_v7, %v122_v4  ;;  %v128_v11 = vmul.u32 %v124_v6, %v123_v5  ;;  %v149_v12 = vmul.u32 %v147_v9, %v122_v4  ;;  %v150_v13 = vmul.u32 %v146_v8, %v123_v5 }
  0xb6   :  { %392 = vrot.lane.b32.xlu1 %v991_v48, %s913_s0  ;;  %v126_v14 = vmul.u32 %v124_v6, %v122_v4  ;;  %v129_v17 = vmul.u32 %v125_v7, %v123_v5  ;;  %v148_v18 = vmul.u32 %v146_v8, %v122_v4  ;;  %v151_v23 = vmul.u32 %v147_v9, %v123_v5 }
  0xb7   :  { %v130_v15 = vshll.u32 %v127_v10, 16  ;;  %v152_v20 = vshll.u32 %v149_v12, 16  ;;  %v132_v21 = vshll.u32 %v128_v11, 16  ;;  %v154_v26 = vshll.u32 %v150_v13, 16 }
  0xb8   :  { %v131_v37 = vshrl.u32 %v127_v10, 16  ;;  %v153_v40 = vshrl.u32 %v149_v12, 16  ;;  %v133_v44 = vshrl.u32 %v128_v11, 16  ;;  %v155_v46 = vshrl.u32 %v150_v13, 16 }
  0xb9   :  { %vm134_vm11 = vc.u32 %v126_v14, %v130_v15  ;;  %v136_v22 = vadd.s32 %v130_v15, %v126_v14  ;;  %vm156_vm12 = vc.u32 %v148_v18, %v152_v20  ;;  %v158_v27 = vadd.s32 %v152_v20, %v148_v18 }
  0xba   :  { %v135_v25 = vsel %vm134_vm11, 1, %v914_v24  ;;  %v157_v29 = vsel %vm156_vm12, 1, %v914_v24  ;;  %v915_v12 = vmov 3  }
  0xbb   :  { %v137_v28 = vadd.s32 %v135_v25, %v129_v17  ;;  %vm138_vm13 = vc.u32 %v136_v22, %v132_v21  ;;  %v159_v32 = vadd.s32 %v157_v29, %v151_v23  ;;  %vm160_vm14 = vc.u32 %v158_v27, %v154_v26  ;;  %853 = vset.pattern.permute.xlu0 %v915_v12 }
  0xbc   :  { %v139_v31 = vsel %vm138_vm13, 1, %v914_v24  ;;  %v161_v39 = vsel %vm160_vm14, 1, %v914_v24  ;;  %v162_v50 = vadd.s32 %v158_v27, %v154_v26  ;;  %855 = vset.pattern.permute.xlu2 %v915_v12  ;;  %854 = vset.pattern.permute.xlu1 %v915_v12 }
  0xbd   :  { %v141_v38 = vadd.s32 %v139_v31, %v137_v28  ;;  %v163_v41 = vadd.s32 %v161_v39, %v159_v32 }
  0xbe   :  { %457 = vrot.lane.b32.xlu1 %v959_v0, %s913_s0 }
  0xbf   :  { %v142_v45 = vadd.s32 %v141_v38, %v131_v37  ;;  %v164_v47 = vadd.s32 %v163_v41, %v153_v40 }
  0xc1   :  { %v143_v49 = vadd.s32 %v142_v45, %v133_v44  ;;  %v165_v35 = vadd.s32 %v164_v47, %v155_v46 }
  0xc3   :  { %vm168_vm15 = vc.u32 %v143_v49, %v162_v50  ;;  %v169_v51 = vadd.s32 1, %v165_v35  ;;  %v167_v33 = vadd.s32 %v162_v50, %v143_v49 }
  0xc5   :  { %v170_v56 = vsel %vm168_vm15, %v169_v51, %v165_v35 }
  0xc6   :  { %v171_v57 = vadd.s32 %v170_v56, %v166_v52 }
  0xc8   :  { %v172_v53 = vadd.s32 536870912, %v171_v57 }
  0xca   :  { %v173_v58 = vshrl.u32 %v172_v53, 30 }
  0xcc   :  { %v174_v59 = vshll.u32 %v173_v58, 30  ;;  %v197_v14 = vsub.s32 4, %v173_v58 }
  0xce   :  { %v175_v54 = vsub.s32 %v171_v57, %v174_v59  ;;  %v198_v20 = vsel %vm75_vm2, %v197_v14, %v173_v58  ;;  %v1111_v14 = vpop.permute.xlu0 %453 }
  0xcf   :  { %v200_v23 = vsel %vm74_vm3, 0, %v198_v20 }
  0xd0   :  { %vm176_vm0 = vcmp.lt.s32.totalorder %v175_v54, 0  ;;  %v177_v60 = vsub.s32 0, %v175_v54  ;;  %v217_v28 = vadd.s32 3, %v200_v23  ;;  %v372_v38 = vand.u32 3, %v200_v23 }
  0xd2   :  { %v178_v61 = vsel %vm176_vm0, %v177_v60, %v175_v54  ;;  %v218_v36 = vand.u32 3, %v217_v28  ;;  %vm373_vm7 = vcmp.lt.s32.totalorder %v372_v38, 2  ;;  %vm374_vm8 = vcmp.eq.s32.totalorder %v372_v38, 0  ;;  %v1059_v60 = vpop.permute.xlu2 %462 }
  0xd3   :  { %v179_v62 = vclz %v178_v61  ;;  %vm377_vm9 = vcmp.eq.s32.totalorder %v372_v38, 2 }
  0xd4   :  { %vm223_vm5 = vcmp.eq.s32.totalorder %v218_v36, 2  ;;  %vm220_vm6 = vcmp.eq.s32.totalorder %v218_v36, 0  ;;  %vm219_vm10 = vcmp.lt.s32.totalorder %v218_v36, 2 }
  0xd5   :  { %v824_v63 = vadd.s32 4294967294, %v179_v62 }
  0xd7   :  { %vm825_vm1 = vcmp.lt.s32.totalorder %v824_v63, 0 }
  0xd8   :  { %v182_v1 = vsel %vm825_vm1, 0, %v824_v63 }
  0xd9   :  { %v183_v2 = vsub.s32 32, %v182_v1  ;;  %v187_v3 = vsub.s32 4294967266, %v182_v1  ;;  %v184_v4 = vshll.u32 %v175_v54, %v182_v1 }
  0xdb   :  { %v185_v5 = vshrl.u32 %v167_v33, %v183_v2  ;;  %v188_v6 = vadd.s32 127, %v187_v3  ;;  %v1080_v2 = vstv %s834_s30 }
  0xdd   :  { %v186_v55 = vor.u32 %v185_v5, %v184_v4  ;;  %v189_v7 = vshll.u32 %v188_v6, 23 }
  0xdf   :  { %v190_v8 = vor.u32 4788187, %v189_v7  ;;  %v193_v10 = vcvt.s32.f32 %v186_v55 }
  0xe1   :  { %v191_v9 = vand.u32 2147483647, %v190_v8 }
  0xe3   :  { %v194_v11 = vmul.f32 %v193_v10, %v191_v9 }
  0xe5   :  { %v195_v13 = vxor.u32 2147483648, %v194_v11 }
  0xe7   :  { %v196_v15 = vsel %vm75_vm2, %v195_v13, %v194_v11 }
  0xe8   :  { %v199_v17 = vsel %vm74_vm3, %v968_v16, %v196_v15 }
  0xe9   :  { %v201_v18 = vmul.f32 %v199_v17, %v199_v17 }
  0xeb   :  { %v202_v21 = vmul.f32 -0.001358992, %v201_v18  ;;  %v209_v22 = vmul.f32 -0.00019511016, %v201_v18 }
  0xed   :  { %v203_v24 = vadd.f32 0.041655596, %v202_v21  ;;  %v210_v25 = vadd.f32 0.008332121, %v209_v22 }
  0xef   :  { %v204_v26 = vmul.f32 %v203_v24, %v201_v18  ;;  %v211_v27 = vmul.f32 %v210_v25, %v201_v18 }
  0xf1   :  { %v205_v29 = vadd.f32 -0.4999988, %v204_v26  ;;  %v212_v30 = vadd.f32 -0.16666654, %v211_v27 }
  0xf3   :  { %v206_v31 = vmul.f32 %v205_v29, %v201_v18  ;;  %v213_v32 = vmul.f32 %v212_v30, %v201_v18 }
  0xf5   :  { %v207_v37 = vadd.f32 1.0, %v206_v31  ;;  %v214_v19 = vadd.f32 1.0, %v213_v32 }
  0xf7   :  { %v215_v39 = vmul.f32 %v214_v19, %v199_v17  ;;  %v224_v40 = vxor.u32 2147483648, %v207_v37 }
  0xf9   :  { %v221_v41 = vxor.u32 2147483648, %v215_v39  ;;  %v225_v42 = vsel %vm223_vm5, %v224_v40, %v215_v39  ;;  %v379_v45 = vsel %vm377_vm9, %v224_v40, %v215_v39  ;;  %v1140_v39 = vstv %s1072_s7 }
  0xfb   :  { %v222_v43 = vsel %vm220_vm6, %v207_v37, %v221_v41  ;;  %v376_v44 = vsel %vm374_vm8, %v207_v37, %v221_v41  ;;  %v1134_v37 = vstv %s1078_s8 }
  0xfc   :  { %v226_v46 = vsel %vm219_vm10, %v222_v43, %v225_v42  ;;  %v380_v47 = vsel %vm373_vm7, %v376_v44, %v379_v45  ;;  %v1150_v43 = vstv %s1097_s10  ;;  %v1153_v44 = vstv %s1090_s9 }
  0xfd   :  { %v1040_v49 = vsel %vm63_vm4, nan, %v380_v47  ;;  %v227_v54 = vsel %vm63_vm4, nan, %v226_v46  ;;  %v1158_v46 = vstv %s1109_s11  ;;  %vm796_vm10 = vcmask 0  }
  0xfe   :  { %v384_v50 = vsub.f32 1.0, %v1040_v49  ;;  %v1062_v61 = vmul.f32 %v227_v54, %v991_v48  ;;  %v419_v33 = vmul.f32 %v1045_v34, %v227_v54 }
 0x100   :  { %v396_v35 = vmul.f32 %v1045_v34, %v384_v50  ;;  %v1065_v62 = vsub.f32 1.0, %v1062_v61  ;;  %v1083_v3 = vmul.f32 %v384_v50, %v991_v48 }
 0x102   :  { %v397_v51 = vmul.f32 %v396_v35, %v1045_v34  ;;  %v428_v63 = vmul.f32 %v1045_v34, %v1065_v62 }
 0x104   :  { %v1050_v52 = vadd.f32 %v397_v51, %v1040_v49 }
 0x106   :  { %v569_v56 = vperm.slane %v1050_v52, 0  ;;  %v632_v40 = vmul.f32 %v1080_v2, %v1050_v52 }
 0x108   :  { %571 = vperm.xlu0 %853, %v569_v56  }
 0x120   :  { %v389_v57 = vpop.permute.xlu1 %388 }
 0x121   :  { %v391_v53 = vmul.f32 %v389_v57, %v959_v0 }
 0x123   :  { %400 = vrot.lane.b32.xlu2 %v391_v53, %s903_s27  ;;  %s807_s27 = sshll.u32 %s917_s26, 4  ;;  %s808_s27 = int_to_ptr.vmem [resolvable:$true] %s807_s27 }
 0x128   :  { %v393_v58 = vpop.permute.xlu1 %392 }
 0x129   :  { %v395_v59 = vmul.f32 %v393_v58, %v959_v0  ;;  %v429_v0 = vmul.f32 %v428_v63, %v1045_v34 }
 0x12b   :  { %405 = vrot.lane.b32.xlu2 %v395_v59, %s904_s28  ;;  %v430_v4 = vadd.f32 %v429_v0, %v1062_v61 }
 0x12d   :  { %v456_v30 = vmul.f32 %v1111_v14, %v430_v4 }
 0x130   :  { %v1125_v25 = vpop.permute.xlu1 %457 }
 0x17d   :  { %v1069_v1 = vpop.permute.xlu2 %400 }
 0x17e   :  { %v1075_v16 = vmul.f32 %v1069_v1, %v384_v50  ;;  %v411_v6 = vmul.f32 %v1069_v1, %v227_v54  ;;  %v403_v55 = vmul.f32 %v1069_v1, %v396_v35  ;;  %v431_v10 = vmul.f32 %v428_v63, %v1069_v1 }
 0x17f   :  { %v1107_v13 = vmul.f32 %v1069_v1, %v1083_v3 }
 0x180   :  { %v414_v20 = vmul.f32 %v1075_v16, %v1045_v34 }
 0x185   :  { %v1086_v5 = vpop.permute.xlu2 %405 }
 0x186   :  { %v410_v7 = vmul.f32 %v1086_v5, %v396_v35  ;;  %v408_v8 = vmul.f32 %v1086_v5, %v227_v54  ;;  %v418_v9 = vmul.f32 %v1075_v16, %v1086_v5  ;;  %v421_v48 = vmul.f32 %v1086_v5, %v384_v50 }
 0x187   :  { %v1102_v11 = vmul.f32 %v1086_v5, %v1083_v3  ;;  %v434_v12 = vmul.f32 %v428_v63, %v1086_v5  ;;  %v586_v35 = vmul.f32 %v1140_v39, %v1050_v52  ;;  %v445_v54 = vmul.f32 %v1086_v5, %v1065_v62 }
 0x188   :  { %v1113_v15 = vadd.f32 %v411_v6, %v410_v7  ;;  %v1115_v17 = vsub.f32 %v403_v55, %v408_v8  ;;  %v1117_v18 = vsub.f32 %v418_v9, %v419_v33  ;;  %v426_v21 = vmul.f32 %v421_v48, %v1086_v5 }
 0x189   :  { %v433_v22 = vsub.f32 %v431_v10, %v1102_v11  ;;  %v436_v23 = vadd.f32 %v1107_v13, %v434_v12  ;;  %v422_v24 = vmul.f32 %v421_v48, %v1045_v34  ;;  %v424_v29 = vmul.f32 %v421_v48, %v1069_v1 }
 0x18a   :  { %v553_v26 = vperm.slane %v1113_v15, 0  ;;  %v561_v27 = vperm.slane %v1115_v17, 0  ;;  %v521_v28 = vperm.slane %v1117_v18, 0  ;;  %v415_v36 = vadd.f32 %v414_v20, %v408_v8 }
 0x18b   :  { %v460_v31 = vmul.f32 %v1125_v25, %v433_v22  ;;  %v423_v32 = vsub.f32 %v422_v24, %v411_v6  ;;  %v465_v38 = vmul.f32 %v1059_v60, %v436_v23  ;;  %v1145_v41 = vadd.f32 %v426_v21, %v1040_v49 }
 0x18c   :  { %555 = vperm.xlu1 %854, %v553_v26   ;;  %563 = vperm.xlu2 %855, %v561_v27   ;;  %v1147_v42 = vadd.f32 %v424_v29, %v419_v33  ;;  %v634_v47 = vmul.f32 %v1153_v44, %v415_v36  ;;  %v588_v51 = vmul.f32 %v1158_v46, %v415_v36  ;;  %v1182_v8 = vstv %s1136_s12 }
 0x18d   :  { %523 = vperm.xlu0 %853, %v521_v28   ;;  %v461_v19 = vadd.f32 %v460_v31, %v456_v30  ;;  %v637_v50 = vmul.f32 %v1134_v37, %v423_v32  ;;  %v591_v57 = vmul.f32 %v1150_v43, %v423_v32  ;;  %v489_v53 = vperm.slane %v1145_v41, 0 }
 0x18e   :  { %v635_v56 = vadd.f32 %v634_v47, %v632_v40  ;;  %v497_v58 = vperm.slane %v1147_v42, 0  ;;  %v589_v59 = vadd.f32 %v588_v51, %v586_v35  ;;  %v598_v0 = vmul.f32 %v1140_v39, %v1113_v15 }
 0x18f   :  { %v1155_v45 = vadd.f32 %v465_v38, %v461_v19  ;;  %v599_v33 = vmul.f32 %v1158_v46, %v1117_v18  ;;  %v416_v6 = vmul.f32 %v1075_v16, %v1069_v1  ;;  %v437_v7 = vmul.f32 %v1069_v1, %v1065_v62 }
 0x190   :  { %v638_v4 = vadd.f32 %v637_v50, %v635_v56  ;;  %v1177_v55 = vadd.f32 %v591_v57, %v589_v59  ;;  %v1184_v9 = vstv %s832_s13  ;;  %v1186_v48 = vstv %s833_s14 }
 0x191   :  { %v545_v63 = vperm.slane %v1155_v45, 0  ;;  %v600_v10 = vadd.f32 %v599_v33, %v598_v0  ;;  %v601_v12 = vmul.f32 %v1150_v43, %v1145_v41  ;;  %v446_v20 = vmul.f32 %v445_v54, %v1045_v34 }
 0x192   :  { %v448_v16 = vmul.f32 %v445_v54, %v1069_v1  ;;  %v417_v21 = vadd.f32 %v416_v6, %v1040_v49  ;;  %v609_v62 = vmul.f32 %v1182_v8, %v1050_v52  ;;  %v611_v22 = vmul.f32 %v1184_v9, %v415_v36 }
 0x193   :  { %v443_v23 = vmul.f32 %v1045_v34, %v1083_v3  ;;  %v438_v24 = vmul.f32 %v437_v7, %v1045_v34  ;;  %v440_v26 = vmul.f32 %v437_v7, %v1069_v1  ;;  %v614_v27 = vmul.f32 %v1186_v48, %v423_v32 }
 0x194   :  { %491 = vperm.xlu1 %854, %v489_v53   ;;  %499 = vperm.xlu2 %855, %v497_v58   ;;  %v505_v28 = vperm.slane %v423_v32, 0  ;;  %v537_v29 = vperm.slane %v415_v36, 0  ;;  %v593_v30 = vmul.f32 %v1140_v39, %v1115_v17  ;;  %v612_v49 = vadd.f32 %v611_v22, %v609_v62 }
 0x195   :  { %547 = vperm.xlu0 %853, %v545_v63   ;;  %v602_v31 = vadd.f32 %v601_v12, %v600_v10  ;;  %v447_v52 = vsub.f32 %v446_v20, %v1107_v13  ;;  %v449_v19 = vadd.f32 %v448_v16, %v443_v23  ;;  %v439_v38 = vadd.f32 %v438_v24, %v1102_v11 }
 0x196   :  { %v594_v34 = vmul.f32 %v1158_v46, %v417_v21  ;;  %v615_v3 = vadd.f32 %v614_v27, %v612_v49  ;;  %v441_v1 = vadd.f32 %v440_v26, %v1062_v61  ;;  %v450_v32 = vmul.f32 %v445_v54, %v1086_v5 }
 0x197   :  { %v442_v36 = vmul.f32 %v437_v7, %v1086_v5  ;;  %v596_v47 = vmul.f32 %v1150_v43, %v1147_v42  ;;  %v472_v13 = vmul.f32 %v1111_v14, %v447_v52  ;;  %v473_v11 = vmul.f32 %v1125_v25, %v449_v19 }
 0x198   :  { %v595_v40 = vadd.f32 %v594_v34, %v593_v30  ;;  %v467_v50 = vmul.f32 %v1111_v14, %v439_v38  ;;  %v468_v35 = vmul.f32 %v1125_v25, %v441_v1  ;;  %v451_v51 = vadd.f32 %v450_v32, %v1062_v61 }
 0x199   :  { %v444_v56 = vsub.f32 %v442_v36, %v443_v23  ;;  %v529_v57 = vperm.slane %v417_v21, 0  ;;  %v639_v5 = vmul.f32 %v1080_v2, %v1115_v17  ;;  %v474_v58 = vadd.f32 %v473_v11, %v472_v13 }
 0x19a   :  { %v597_v53 = vadd.f32 %v596_v47, %v595_v40  ;;  %v469_v59 = vadd.f32 %v468_v35, %v467_v50  ;;  %v640_v54 = vmul.f32 %v1153_v44, %v417_v21  ;;  %v475_v63 = vmul.f32 %v1059_v60, %v451_v51 }
 0x19b   :  { %v470_v14 = vmul.f32 %v1059_v60, %v444_v56  ;;  %v642_v61 = vmul.f32 %v1134_v37, %v1147_v42  ;;  %v616_v7 = vmul.f32 %v1182_v8, %v1115_v17  ;;  %v644_v10 = vmul.f32 %v1080_v2, %v1113_v15 }
 0x19c   :  { %507 = vperm.xlu1 %854, %v505_v28   ;;  %539 = vperm.xlu2 %855, %v537_v29   ;;  %v641_v25 = vadd.f32 %v640_v54, %v639_v5  ;;  %v476_v0 = vadd.f32 %v475_v63, %v474_v58  ;;  %v649_v60 = vmul.f32 %v1080_v2, %v1155_v45 }
 0x19d   :  { %675 = vperm.xlu0 %853, %v602_v31   ;;  %v471_v33 = vadd.f32 %v470_v14, %v469_v59  ;;  %v617_v16 = vmul.f32 %v1184_v9, %v417_v21  ;;  %v619_v17 = vmul.f32 %v1186_v48, %v1147_v42  ;;  %v647_v23 = vmul.f32 %v1134_v37, %v1145_v41 }
 0x19e   :  { %v643_v6 = vadd.f32 %v642_v61, %v641_v25  ;;  %v481_v12 = vperm.slane %v476_v0, 0  ;;  %v652_v26 = vmul.f32 %v1134_v37, %v476_v0  ;;  %v629_v42 = vmul.f32 %v1186_v48, %v476_v0 }
 0x19f   :  { %v650_v20 = vmul.f32 %v1153_v44, %v471_v33  ;;  %v618_v62 = vadd.f32 %v617_v16, %v616_v7  ;;  %v627_v21 = vmul.f32 %v1184_v9, %v471_v33  ;;  %v621_v29 = vmul.f32 %v1182_v8, %v1113_v15 }
 0x1a0   :  { %v513_v30 = vperm.slane %v471_v33, 0  ;;  %v622_v37 = vmul.f32 %v1184_v9, %v1117_v18  ;;  %v603_v49 = vmul.f32 %v1140_v39, %v1155_v45  ;;  %v604_v31 = vmul.f32 %v1158_v46, %v471_v33  ;;  %v778_v39 = vld [vmem:[%s1285_s3 + $0x8] sm:$0xff] }
 0x1a1   :  { %v651_v24 = vadd.f32 %v650_v20, %v649_v60  ;;  %v620_v2 = vadd.f32 %v619_v17, %v618_v62  ;;  %v624_v38 = vmul.f32 %v1186_v48, %v1145_v41  ;;  %v606_v15 = vmul.f32 %v1150_v43, %v476_v0  ;;  %v779_v41 = vld [vmem:[%s1285_s3 + $0x10] sm:$0xff]  ;;  %v780_v48 = vld [vmem:[%s1285_s3 + $0x18] sm:$0xff] }
 0x1a2   :  { %v623_v19 = vadd.f32 %v622_v37, %v621_v29  ;;  %v605_v34 = vadd.f32 %v604_v31, %v603_v49  ;;  %v782_v46 = vmul.f32 %v778_v39, %v778_v39  ;;  %v783_v9 = vmul.f32 %v779_v41, %v779_v41 }
 0x1a3   :  { %v477_v33 = vlaneseq }
 0x1a4   :  { %531 = vperm.xlu1 %854, %v529_v57   ;;  %664 = vperm.xlu2 %855, %v597_v53   ;;  %v607_v1 = vadd.f32 %v606_v15, %v605_v34  ;;  %v572_v53 = vpop.permute.xlu0 %571 }
 0x1a5   :  { %729 = vperm.xlu0 %853, %v638_v4   ;;  %v645_v4 = vmul.f32 %v1153_v44, %v1117_v18  ;;  %v653_v44 = vadd.f32 %v652_v26, %v651_v24  ;;  %v777_v18 = vld [vmem:[%s1285_s3] sm:$0xff] }
 0x1a7   :  { %v646_v22 = vadd.f32 %v645_v4, %v644_v10  ;;  %v478_v10 = vand.u32 127, %v477_v33 }
 0x1a9   :  { %v648_v27 = vadd.f32 %v647_v23, %v646_v22  ;;  %vm479_vm4 = vcmp.eq.s32.totalorder %v478_v10, 11  ;;  %vm487_vm11 = vcmp.eq.s32.totalorder %v478_v10, 10  ;;  %vm495_vm12 = vcmp.eq.s32.totalorder %v478_v10, 9  ;;  %v654_v23 = vld [vmem:[%s1284_s2] sm:$0xff] }
 0x1aa   :  { %vm503_vm13 = vcmp.eq.s32.totalorder %v478_v10, 8  ;;  %vm511_vm14 = vcmp.eq.s32.totalorder %v478_v10, 7  ;;  %vm519_vm15 = vcmp.eq.s32.totalorder %v478_v10, 6  ;;  %vm527_vm0 = vcmp.eq.s32.totalorder %v478_v10, 5 }
 0x1ab   :  { %vm535_vm1 = vcmp.eq.s32.totalorder %v478_v10, 4  ;;  %vm543_vm2 = vcmp.eq.s32.totalorder %v478_v10, 3  ;;  %vm551_vm3 = vcmp.eq.s32.totalorder %v478_v10, 2  ;;  %vm559_vm5 = vcmp.eq.s32.totalorder %v478_v10, 1 }
 0x1ac   :  { %736 = vperm.xlu2 %855, %v643_v6   ;;  %657 = vperm.xlu1 %854, %v1177_v55   ;;  %v626_v55 = vmul.f32 %v1182_v8, %v1155_v45  ;;  %v625_v8 = vadd.f32 %v624_v38, %v623_v19  ;;  %v781_v45 = vmul.f32 %v777_v18, %v777_v18  ;;  %vm567_vm6 = vcmp.eq.s32.totalorder %v478_v10, 0 }
 0x1ad   :  { %483 = vperm.xlu0 %853, %v481_v12  }
 0x1ae   :  { %v628_v28 = vadd.f32 %v627_v21, %v626_v55  ;;  %v785_v43 = vadd.f32 %v782_v46, %v781_v45 }
 0x1b0   :  { %v630_v52 = vadd.f32 %v629_v42, %v628_v28  ;;  %v786_v32 = vadd.f32 %v785_v43, %v783_v9 }
 0x1b4   :  { %700 = vperm.xlu2 %855, %v620_v2   ;;  %747 = vperm.xlu1 %854, %v648_v27  }
 0x1b5   :  { %758 = vperm.xlu0 %853, %v653_v44  }
 0x1bc   :  { %693 = vperm.xlu1 %854, %v615_v3   ;;  %515 = vperm.xlu2 %855, %v513_v30   ;;  %v784_v3 = vmul.f32 %v780_v48, %v780_v48 }
 0x1bd   :  { %722 = vperm.xlu0 %853, %v630_v52  }
 0x1be   :  { %v787_v36 = vadd.f32 %v786_v32, %v784_v3 }
 0x1c0   :  { %v788_v40 = vrot.slane %v787_v36, 4 }
 0x1c2   :  { %v789_v47 = vadd.f32 %v788_v40, %v787_v36 }
 0x1c4   :  { %711 = vperm.xlu2 %855, %v625_v8   ;;  %686 = vperm.xlu1 %854, %v607_v1   ;;  %v790_v13 = vrot.slane %v789_v47, 2 }
 0x1c6   :  { %v791_v11 = vadd.f32 %v790_v13, %v789_v47 }
 0x1c8   :  { %v792_v35 = vrot.slane %v791_v11, 1 }
 0x1ca   :  { %v793_v51 = vadd.f32 %v792_v35, %v791_v11 }
 0x1e6   :  { %v564_v50 = vpop.permute.xlu2 %563 }
 0x1ee   :  { %v500_v56 = vpop.permute.xlu2 %499  ;;  %794 = vadd.xlane.f32.xlu1 %v793_v51 }
 0x1f6   :  { %v540_v57 = vpop.permute.xlu2 %539 }
 0x1fe   :  { %v556_v5 = vpop.permute.xlu1 %555  ;;  %v665_v59 = vpop.permute.xlu2 %664 }
 0x1ff   :  { %v524_v58 = vpop.permute.xlu0 %523  ;;  %v667_v29 = vperm.slane %v665_v59, 0 }
 0x201   :  { %v668_v45 = vmul.f32 %v667_v29, %v654_v23 }
 0x203   :  { %v670_v47 = vrot.slane %v668_v45, 1 }
 0x206   :  { %v492_v54 = vpop.permute.xlu1 %491  ;;  %v737_v14 = vpop.permute.xlu2 %736 }
 0x207   :  { %v548_v63 = vpop.permute.xlu0 %547  ;;  %v739_v20 = vperm.slane %v737_v14, 0 }
 0x209   :  { %v740_v26 = vmul.f32 %v739_v20, %v654_v23 }
 0x20b   :  { %v742_v30 = vrot.slane %v740_v26, 1 }
 0x20e   :  { %v508_v25 = vpop.permute.xlu1 %507  ;;  %v701_v0 = vpop.permute.xlu2 %700 }
 0x20f   :  { %v1265_v61 = vpop.permute.xlu0 %675  ;;  %v703_v52 = vperm.slane %v701_v0, 0 }
 0x210   :  { %v678_v41 = vperm.slane %v1265_v61, 0 }
 0x211   :  { %v704_v46 = vmul.f32 %v703_v52, %v654_v23 }
 0x212   :  { %v679_v11 = vmul.f32 %v678_v41, %v654_v23 }
 0x213   :  { %v706_v13 = vrot.slane %v704_v46, 1 }
 0x216   :  { %v532_v6 = vpop.permute.xlu1 %531  ;;  %v516_v4 = vpop.permute.xlu2 %515 }
 0x217   :  { %v730_v7 = vpop.permute.xlu0 %729 }
 0x218   :  { %v732_v17 = vperm.slane %v730_v7, 0  ;;  %v916_v7 = vmov 0.0  }
 0x21a   :  { %v733_v44 = vmul.f32 %v732_v17, %v654_v23 }
 0x21c   :  { %v744_v34 = vadd.f32 %v742_v30, %v733_v44 }
 0x21e   :  { %v658_v12 = vpop.permute.xlu1 %657  ;;  %v712_v37 = vpop.permute.xlu2 %711 }
 0x21f   :  { %v484_v60 = vpop.permute.xlu0 %483  ;;  %v660_v8 = vperm.slane %v658_v12, 0  ;;  %v714_v1 = vperm.slane %v712_v37, 0 }
 0x220   :  { %v486_v16 = vsel %vm479_vm4, %v484_v60, 0.0 }
 0x221   :  { %v494_v62 = vsel %vm487_vm11, %v492_v54, %v486_v16  ;;  %v661_v3 = vmul.f32 %v660_v8, %v654_v23  ;;  %v715_v32 = vmul.f32 %v714_v1, %v654_v23 }
 0x222   :  { %v502_v22 = vsel %vm495_vm12, %v500_v56, %v494_v62 }
 0x223   :  { %v510_v24 = vsel %vm503_vm13, %v508_v25, %v502_v22  ;;  %v672_v51 = vadd.f32 %v670_v47, %v661_v3  ;;  %v717_v56 = vrot.slane %v715_v32, 2 }
 0x224   :  { %v518_v2 = vsel %vm511_vm14, %v516_v4, %v510_v24 }
 0x225   :  { %v526_v27 = vsel %vm519_vm15, %v524_v58, %v518_v2 }
 0x226   :  { %v534_v55 = vsel %vm527_vm0, %v532_v6, %v526_v27  ;;  %v748_v21 = vpop.permute.xlu1 %747 }
 0x227   :  { %v542_v28 = vsel %vm535_vm1, %v540_v57, %v534_v55  ;;  %v750_v42 = vperm.slane %v748_v21, 0  ;;  %v759_v31 = vpop.permute.xlu0 %758 }
 0x228   :  { %v550_v49 = vsel %vm543_vm2, %v548_v63, %v542_v28  ;;  %v761_v43 = vperm.slane %v759_v31, 0 }
 0x229   :  { %v558_v19 = vsel %vm551_vm3, %v556_v5, %v550_v49  ;;  %v751_v38 = vmul.f32 %v750_v42, %v654_v23  ;;  %v681_v5 = vrot.slane %v679_v11, 2 }
 0x22a   :  { %v566_v15 = vsel %vm559_vm5, %v564_v50, %v558_v19 }
 0x22b   :  { %v574_v18 = vsel %vm567_vm6, %v572_v53, %v566_v15  ;;  %v753_v39 = vrot.slane %v751_v38, 2  ;;  %v765_v53 = vshrl.u32 %v477_v33, 7  ;;  %v683_v25 = vadd.f32 %v681_v5, %v672_v51 }
 0x22c   :  { %575 = vst [vmem:[%s1286_s4] sm:$0xff] %v574_v18 }
 0x22d   :  { %v755_v9 = vadd.f32 %v753_v39, %v744_v34  ;;  %vm770_vm7 = vcmp.eq.s32.totalorder %v765_v53, 2  ;;  %vm768_vm8 = vcmp.eq.s32.totalorder %v765_v53, 1  ;;  %vm766_vm9 = vcmp.eq.s32.totalorder %v765_v53, 0 }
 0x22e   :  { %v694_v48 = vpop.permute.xlu1 %693  ;;  %v771_v10 = vsel %vm770_vm7, 1.0, %v916_v7 }
 0x22f   :  { %v762_v36 = vadd.f32 %v761_v43, %v755_v9  ;;  %v696_v40 = vperm.slane %v694_v48, 0  ;;  %v723_v35 = vpop.permute.xlu0 %722 }
 0x230   :  { %v725_v59 = vperm.slane %v723_v35, 0 }
 0x231   :  { %860 = vrcp.f32 %v762_v36  ;;  %v697_v50 = vmul.f32 %v696_v40, %v654_v23 }
 0x233   :  { %v708_v57 = vadd.f32 %v706_v13, %v697_v50 }
 0x235   :  { %v719_v58 = vadd.f32 %v717_v56, %v708_v57 }
 0x236   :  { %v687_v54 = vpop.permute.xlu1 %686 }
 0x237   :  { %v861_v63 = vpop.eup %860  ;;  %v726_v14 = vadd.f32 %v725_v59, %v719_v58  ;;  %v689_v61 = vperm.slane %v687_v54, 0 }
 0x239   :  { %v769_v0 = vmul.f32 %v861_v63, %v726_v14  ;;  %v690_v6 = vadd.f32 %v689_v61, %v683_v25 }
 0x23b   :  { %v772_v4 = vperm.slane %v769_v0, 0  ;;  %v767_v12 = vmul.f32 %v861_v63, %v690_v6 }
 0x23d   :  { %v773_v60 = vsel %vm768_vm8, %v772_v4, %v771_v10  ;;  %v774_v20 = vperm.slane %v767_v12, 0 }
 0x23f   :  { %v775_v33 = vsel %vm766_vm9, %v774_v20, %v773_v60 }
 0x240   :  { %776 = vst [vmem:[%s1287_s5] sm:$0xff] %v775_v33 }
 0x261   :  { %v795_v16 = vpop.xlane.xlu1 %794 }
 0x262   :  { %797 = vst.msk [vmem:[#allocation5] sm:$0x1] %vm796_vm10, %v795_v16 }
 0x263   :  { %812 = dma.vmem_to_hbm [thread:$0]  %s808_s27, 16, %s810_s29, [#allocation3]  }
 0x264   :  { %900 = dma.done.wait [#allocation3], 16  }
 0x265   :  { %901 = vsyncadd [#allocation3], 4294967280 }
 0x266   :  { %821 = vsyncpa [#allocation3], 1 }
 0x267   :  { %822 = vsyncpa [#allocation4], 1 }

</bundles_post_ra>
